<compile_context>
chip_gen: v6e
topology: v6e:2x2x1
jax: 0.10.0
libtpu: 0.0.40
codegen_flags: <defaults>
</compile_context>

<pallas_src>
import functools
import math

import jax
import jax.numpy as jnp
from jax import lax
from jax.experimental import pallas as pl
from jax.experimental.pallas import tpu as pltpu


def _round_up(x: int, m: int) -> int:
    return ((x + m - 1) // m) * m


def _vis_embed_kernel(x_ref, w1_ref, b1_ref, w2_ref, b2_ref, lnw_ref, o_ref,
                      *, out_dim: int, eps: float, use_ln: bool):
    """Fused Linear -> Tanh -> Linear (-> T5LayerNorm) on one token tile.

    x_ref  : [TB, Din]   VMEM (tiled over the grid)
    w1_ref : [Din, H1]   VMEM (resident across grid steps)
    b1_ref : [1,  H1]    VMEM (resident)
    w2_ref : [H1, H2]    VMEM (resident)
    b2_ref : [1,  H2]    VMEM (resident)
    lnw_ref: [1,  H2]    VMEM (resident; unused when use_ln=False)
    o_ref  : [TB, H2]    VMEM (tiled over the grid)
    """
    # Native-dtype operands straight into the MXU; f32 accumulation.
    h = jnp.dot(x_ref[...], w1_ref[...], preferred_element_type=jnp.float32)
    h = jnp.tanh(h + b1_ref[...].astype(jnp.float32))           # EUP transcendental, f32
    h = h.astype(w2_ref.dtype)                                   # back to weight dtype for MXU
    y = jnp.dot(h, w2_ref[...], preferred_element_type=jnp.float32)
    y = y + b2_ref[...].astype(jnp.float32)
    if use_ln:
        # T5LayerNorm: x * rsqrt(mean(x^2) + eps) * weight   (no mean-subtraction, no bias).
        # Divide by the true feature dim so any feature padding would not skew the RMS.
        ms = jnp.sum(y * y, axis=-1, keepdims=True) * (1.0 / float(out_dim))
        y = y * lax.rsqrt(ms + eps)
        y = y * lnw_ref[...].astype(jnp.float32)
    o_ref[...] = y.astype(o_ref.dtype)


def visual_embedding_forward(feats, params, *, n_vis_tokens, d_model,
                             use_vis_layer_norm=True, eps=1e-6, tile_m=256):
    """VisualEmbedding forward.

    feats : [B, V_W_L, feat_dim]
    params: dict with w1 [feat_dim,H1], b1 [1,H1], w2 [H1,H2], b2 [1,H2],
            optional ln_weight [1,H2]   (weights stored [in, out], i.e. the
            transpose of PyTorch nn.Linear's [out, in]).
    returns [B, V_W_L * n_vis_tokens, d_model]
    """
    B, V, feat_dim = feats.shape
    w1, b1, w2, b2 = params["w1"], params["b1"], params["w2"], params["b2"]
    H1 = w1.shape[1]
    H2 = w2.shape[1]
    assert H2 == d_model * n_vis_tokens
    lnw = params.get("ln_weight")
    if lnw is None:
        lnw = jnp.ones((1, H2), dtype=feats.dtype)

    M = B * V
    x = feats.reshape(M, feat_dim)

    # Token-dim tiling: TB must be a multiple of 8 (sublane); pad rows so the
    # grid divides evenly (padded rows are computed and then sliced away).
    assert tile_m % 8 == 0
    TB = min(tile_m, _round_up(M, 8))
    M_pad = _round_up(M, TB)
    if M_pad != M:
        x = jnp.pad(x, ((0, M_pad - M), (0, 0)))

    itemsize = jnp.dtype(feats.dtype).itemsize
    # VMEM budget: resident weights + double-buffered in/out tiles + f32 intermediates.
    resident = (feat_dim * H1 + H1 + H1 * H2 + 2 * H2) * itemsize
    tiles = 2 * 2 * (TB * feat_dim + TB * H2) * itemsize
    scratch = 4 * TB * (H1 + H2) * 4
    vmem_limit = int(max(32 * 1024 * 1024,
                         min(96 * 1024 * 1024, 2 * (resident + tiles + scratch))))

    kernel = functools.partial(_vis_embed_kernel, out_dim=H2, eps=float(eps),
                               use_ln=bool(use_vis_layer_norm))

    cost = pl.CostEstimate(
        flops=2 * M_pad * (feat_dim * H1 + H1 * H2),
        transcendentals=M_pad * H1,
        bytes_accessed=(M_pad * (feat_dim + H2)) * itemsize + resident,
    )

    out = pl.pallas_call(
        kernel,
        out_shape=jax.ShapeDtypeStruct((M_pad, H2), feats.dtype),
        grid=(M_pad // TB,),
        in_specs=[
            pl.BlockSpec((TB, feat_dim), lambda i: (i, 0)),    # x: tiled over tokens
            pl.BlockSpec((feat_dim, H1), lambda i: (0, 0)),    # w1: resident
            pl.BlockSpec((1, H1), lambda i: (0, 0)),           # b1: resident
            pl.BlockSpec((H1, H2), lambda i: (0, 0)),          # w2: resident
            pl.BlockSpec((1, H2), lambda i: (0, 0)),           # b2: resident
            pl.BlockSpec((1, H2), lambda i: (0, 0)),           # ln weight: resident
        ],
        out_specs=pl.BlockSpec((TB, H2), lambda i: (i, 0)),
        compiler_params=pltpu.CompilerParams(
            dimension_semantics=("parallel",),
            vmem_limit_bytes=vmem_limit,
        ),
        cost_estimate=cost,
    )(x, w1, b1, w2, b2, lnw)

    out = out[:M]
    return out.reshape(B, V * n_vis_tokens, d_model)


def init_visual_embedding_params(key, feat_dim, d_model, n_vis_tokens,
                                 use_vis_layer_norm=True, dtype=jnp.float32):
    """nn.Linear default init (uniform +/- 1/sqrt(fan_in)); T5LayerNorm weight = ones."""
    H1 = d_model * n_vis_tokens // 2
    H2 = d_model * n_vis_tokens
    k1, k2, k3, k4 = jax.random.split(key, 4)
    b1_bound = 1.0 / math.sqrt(feat_dim)
    b2_bound = 1.0 / math.sqrt(H1)
    params = {
        "w1": jax.random.uniform(k1, (feat_dim, H1), dtype, -b1_bound, b1_bound),
        "b1": jax.random.uniform(k2, (1, H1), dtype, -b1_bound, b1_bound),
        "w2": jax.random.uniform(k3, (H1, H2), dtype, -b2_bound, b2_bound),
        "b2": jax.random.uniform(k4, (1, H2), dtype, -b2_bound, b2_bound),
    }
    if use_vis_layer_norm:
        params["ln_weight"] = jnp.ones((1, H2), dtype=dtype)
    return params


def visual_embedding_reference(feats, params, *, n_vis_tokens, d_model,
                               use_vis_layer_norm=True, eps=1e-6):
    """Pure-JAX reference (same math as the PyTorch module)."""
    B, V, feat_dim = feats.shape
    x = feats.reshape(B * V, feat_dim)
    h = jnp.tanh(jnp.dot(x, params["w1"], precision=lax.Precision.HIGHEST) + params["b1"])
    y = jnp.dot(h, params["w2"], precision=lax.Precision.HIGHEST) + params["b2"]
    if use_vis_layer_norm:
        var = jnp.mean(y.astype(jnp.float32) ** 2, axis=-1, keepdims=True)
        y = (y * lax.rsqrt(var + eps)) * params["ln_weight"]
    return y.reshape(B, V * n_vis_tokens, d_model)


if __name__ == "__main__":
    # Small config consistent with VisualEmbedding; dims kept lane-dense (x128).
    feat_dim = 128
    d_model = 128
    n_vis_tokens = 2           # H1 = 128, H2 = 256
    use_vis_layer_norm = True
    eps = 1e-6
    B, V_W_L = 2, 8            # flattened token dim = 16

    key = jax.random.PRNGKey(0)
    key, kx = jax.random.split(key)
    feats = jax.random.normal(kx, (B, V_W_L, feat_dim), dtype=jnp.float32)
    params = init_visual_embedding_params(key, feat_dim, d_model, n_vis_tokens,
                                          use_vis_layer_norm, jnp.float32)

    # tile_m=8 exercises the tiled/pipelined path (grid=(2,)) even at this tiny size;
    # real workloads should use the default tile_m=256.
    out = visual_embedding_forward(feats, params, n_vis_tokens=n_vis_tokens,
                                   d_model=d_model,
                                   use_vis_layer_norm=use_vis_layer_norm,
                                   eps=eps, tile_m=8)
    out = jax.block_until_ready(out)

    ref = visual_embedding_reference(feats, params, n_vis_tokens=n_vis_tokens,
                                     d_model=d_model,
                                     use_vis_layer_norm=use_vis_layer_norm, eps=eps)

    assert out.shape == (B, V_W_L * n_vis_tokens, d_model)
    max_err = float(jnp.max(jnp.abs(out - ref)))
    assert jnp.allclose(out, ref, atol=1e-4, rtol=1e-4), f"max abs err = {max_err}"

    print("KERNEL_OK")
</pallas_src>

<mosaic_0001>
module attributes {stable_mosaic.version = 11 : i64} {
  func.func @_vis_embed_kernel(%arg0: i32, %arg1: memref<8x128xf32, #tpu.memory_space<vmem>>, %arg2: memref<128x128xf32, #tpu.memory_space<vmem>>, %arg3: memref<1x128xf32, #tpu.memory_space<vmem>>, %arg4: memref<128x256xf32, #tpu.memory_space<vmem>>, %arg5: memref<1x256xf32, #tpu.memory_space<vmem>>, %arg6: memref<1x256xf32, #tpu.memory_space<vmem>>, %arg7: memref<8x256xf32, #tpu.memory_space<vmem>>) attributes {dimension_semantics = [#tpu.dimension_semantics<parallel>], iteration_bounds = array<i64: 2>, scalar_prefetch = 0 : i64, scratch_operands = 0 : i64, tpu.core_type = #tpu.core_type<tc>, window_params = [{transform_indices = @transform_0, window_bounds = array<i64: 8, 128>}, {pipeline_mode = #tpu.pipeline_mode<synchronous>, transform_indices = @transform_1, window_bounds = array<i64: 128, 128>}, {pipeline_mode = #tpu.pipeline_mode<synchronous>, transform_indices = @transform_2, window_bounds = array<i64: 1, 128>}, {pipeline_mode = #tpu.pipeline_mode<synchronous>, transform_indices = @transform_3, window_bounds = array<i64: 128, 256>}, {pipeline_mode = #tpu.pipeline_mode<synchronous>, transform_indices = @transform_4, window_bounds = array<i64: 1, 256>}, {pipeline_mode = #tpu.pipeline_mode<synchronous>, transform_indices = @transform_5, window_bounds = array<i64: 1, 256>}, {transform_indices = @transform_6, window_bounds = array<i64: 8, 256>}]} {
    %c0 = arith.constant 0 : index
    %c0_0 = arith.constant 0 : index
    %0 = vector.load %arg1[%c0, %c0_0] : memref<8x128xf32, #tpu.memory_space<vmem>>, vector<8x128xf32>
    %c0_1 = arith.constant 0 : index
    %c0_2 = arith.constant 0 : index
    %1 = vector.load %arg2[%c0_1, %c0_2] : memref<128x128xf32, #tpu.memory_space<vmem>>, vector<128x128xf32>
    %cst = arith.constant dense<0.000000e+00> : vector<8x128xf32>
    %2 = tpu.matmul %0, %1, %cst {dimension_numbers = #tpu.dot_dimension_numbers<[1], [0], [0], [1], [0, 0, 1, 1], [], []>} : vector<8x128xf32>, vector<128x128xf32>, vector<8x128xf32> -> vector<8x128xf32>
    %c0_3 = arith.constant 0 : index
    %c0_4 = arith.constant 0 : index
    %3 = vector.load %arg3[%c0_3, %c0_4] : memref<1x128xf32, #tpu.memory_space<vmem>>, vector<1x128xf32>
    %4 = vector.broadcast %3 : vector<1x128xf32> to vector<8x128xf32>
    %5 = arith.addf %2, %4 : vector<8x128xf32>
    %6 = math.tanh %5 : vector<8x128xf32>
    %c0_5 = arith.constant 0 : index
    %c0_6 = arith.constant 0 : index
    %7 = vector.load %arg4[%c0_5, %c0_6] : memref<128x256xf32, #tpu.memory_space<vmem>>, vector<128x256xf32>
    %cst_7 = arith.constant dense<0.000000e+00> : vector<8x256xf32>
    %8 = tpu.matmul %6, %7, %cst_7 {dimension_numbers = #tpu.dot_dimension_numbers<[1], [0], [0], [1], [0, 0, 1, 1], [], []>} : vector<8x128xf32>, vector<128x256xf32>, vector<8x256xf32> -> vector<8x256xf32>
    %c0_8 = arith.constant 0 : index
    %c0_9 = arith.constant 0 : index
    %9 = vector.load %arg5[%c0_8, %c0_9] : memref<1x256xf32, #tpu.memory_space<vmem>>, vector<1x256xf32>
    %10 = vector.broadcast %9 : vector<1x256xf32> to vector<8x256xf32>
    %11 = arith.addf %8, %10 : vector<8x256xf32>
    %12 = arith.mulf %11, %11 : vector<8x256xf32>
    %cst_10 = arith.constant dense<0.000000e+00> : vector<8xf32>
    %13 = vector.multi_reduction <add>, %12, %cst_10 [1] : vector<8x256xf32> to vector<8xf32>
    %14 = vector.shape_cast %13 : vector<8xf32> to vector<8x1xf32>
    %cst_11 = arith.constant 3.906250e-03 : f32
    %15 = vector.broadcast %cst_11 : f32 to vector<8x1xf32>
    %16 = arith.mulf %14, %15 : vector<8x1xf32>
    %cst_12 = arith.constant 9.99999997E-7 : f32
    %17 = vector.broadcast %cst_12 : f32 to vector<8x1xf32>
    %18 = arith.addf %16, %17 : vector<8x1xf32>
    %19 = math.rsqrt %18 : vector<8x1xf32>
    %20 = vector.broadcast %19 : vector<8x1xf32> to vector<8x256xf32>
    %21 = arith.mulf %11, %20 : vector<8x256xf32>
    %c0_13 = arith.constant 0 : index
    %c0_14 = arith.constant 0 : index
    %22 = vector.load %arg6[%c0_13, %c0_14] : memref<1x256xf32, #tpu.memory_space<vmem>>, vector<1x256xf32>
    %23 = vector.broadcast %22 : vector<1x256xf32> to vector<8x256xf32>
    %24 = arith.mulf %21, %23 : vector<8x256xf32>
    %c0_15 = arith.constant 0 : index
    %c0_16 = arith.constant 0 : index
    %25 = vector.load %arg7[%c0_15, %c0_16] : memref<8x256xf32, #tpu.memory_space<vmem>>, vector<8x256xf32>
    tpu.vector_store %arg7[%c0_15, %c0_16], %24 {strides = array<i32>} : memref<8x256xf32, #tpu.memory_space<vmem>>, vector<8x256xf32>,
    return
  }
  func.func @transform_0(%arg0: i32) -> (i32, i32) {
    %c0_i32 = arith.constant 0 : i32
    %c0_i32_0 = arith.constant 0 : i32
    return %arg0, %c0_i32 : i32, i32
  }
  func.func @transform_1(%arg0: i32) -> (i32, i32) {
    %c0_i32 = arith.constant 0 : i32
    %c0_i32_0 = arith.constant 0 : i32
    %c0_i32_1 = arith.constant 0 : i32
    return %c0_i32, %c0_i32_0 : i32, i32
  }
  func.func @transform_2(%arg0: i32) -> (i32, i32) {
    %c0_i32 = arith.constant 0 : i32
    %c0_i32_0 = arith.constant 0 : i32
    %c0_i32_1 = arith.constant 0 : i32
    return %c0_i32, %c0_i32_0 : i32, i32
  }
  func.func @transform_3(%arg0: i32) -> (i32, i32) {
    %c0_i32 = arith.constant 0 : i32
    %c0_i32_0 = arith.constant 0 : i32
    %c0_i32_1 = arith.constant 0 : i32
    return %c0_i32, %c0_i32_0 : i32, i32
  }
  func.func @transform_4(%arg0: i32) -> (i32, i32) {
    %c0_i32 = arith.constant 0 : i32
    %c0_i32_0 = arith.constant 0 : i32
    %c0_i32_1 = arith.constant 0 : i32
    return %c0_i32, %c0_i32_0 : i32, i32
  }
  func.func @transform_5(%arg0: i32) -> (i32, i32) {
    %c0_i32 = arith.constant 0 : i32
    %c0_i32_0 = arith.constant 0 : i32
    %c0_i32_1 = arith.constant 0 : i32
    return %c0_i32, %c0_i32_0 : i32, i32
  }
  func.func @transform_6(%arg0: i32) -> (i32, i32) {
    %c0_i32 = arith.constant 0 : i32
    %c0_i32_0 = arith.constant 0 : i32
    return %arg0, %c0_i32 : i32, i32
  }
}

</mosaic_0001>

<bundles_post_ra>
// kernel: tpu_custom_call.1
= control target key start
LH: loop header
LB: loop body
LE: loop exit
PB: predicated region body
PF: predicated region fallthrough
CT: control target
= control target key end

     0   :  { %s1181_s0 = inlined_call_operand.hbm [shape: f32[16,128], index: 0, kind: input, shape index: {}]   ;;  %s1182_s1 = inlined_call_operand.hbm [shape: f32[128,128], index: 1, kind: input, shape index: {}]   ;;  %s1183_s2 = inlined_call_operand.vmem [shape: f32[1,128], index: 2, kind: input, shape index: {}]   ;;  %s1184_s3 = inlined_call_operand.hbm [shape: f32[128,256], index: 3, kind: input, shape index: {}]   ;;  %s1185_s4 = inlined_call_operand.vmem [shape: f32[1,256], index: 4, kind: input, shape index: {}]   ;;  %s1186_s5 = inlined_call_operand.vmem [shape: f32[1,256], index: 5, kind: input, shape index: {}]   ;;  %s1187_s6 = inlined_call_operand.hbm [shape: f32[16,256], index: 6, kind: output, shape index: {}]  }
   0x1   :  { %1192 = sst [smem:[#allocation12_spill]] %s1182_s1 }
   0x2   :  { %11 = vsyncpa [#allocation3], 0 }
   0x3   :  { %13 = vsyncpa [#allocation3 + $0x1], 0 }
   0x4   :  { %14 = vsyncpa [#allocation6], 0 }
   0x5   :  { %15 = vsyncpa [#allocation4], 0 }
   0x6   :  { %17 = vsyncpa [#allocation4 + $0x1], 0  ;;  %s979_s21 = smov 0   ;;  %s981_s22 = smov 0  }
   0x7   :  { %s983_s23 = smov 0   ;;  %s985_s24 = smov 0  }
   0x8 LB: > { %s1000_s25 = sadd.s32 4294967295, %s932_s24   ;;  %s636_s26 = sadd.s32 4294967294, %s932_s24   ;;  %s932_s24 = sphi %s985_s24, %s1211_s24   ;;  %s928_s23 = sphi %s983_s23, %s1210_s23   ;;  %s924_s22 = sphi %s981_s22, %s1209_s22   ;;  %s920_s21 = sphi %s979_s21, %s1208_s21  }
   0x9   : > { %p43_p0 = scmp.ne.s32.totalorder %s924_s22, %s920_s21  ;;  %p1188_p1 = scmp.eq.s32.totalorder %s1000_s25, 0 }
   0xa   : > { %p178_p3 = scmp.eq.s32.totalorder %s636_s26, 1  ;;  %p637_p5 = scmp.ge.s32.totalorder %s932_s24, 1 }
   0xb   : > { %p1009_p4 = por %p1188_p1, %p43_p0  ;;  %p185_p7 = scmp.lt.s32.totalorder %s932_s24, 3 }
   0xc   : > { %p1014_p6 = por %p178_p3, %p43_p0  ;;  %s934_s30 = smov [#allocation5]  }
   0xd   : > { %s1193_s27 = scalar_select %p1009_p4, 1, 0 }
   0xe   : > { %s1194_s28 = scalar_select %p1014_p6, 1, 0 }
   0xf   : > { %p1019_p8 = pnand %p637_p5, %p185_p7  ;;  %s197_s7 = sshll.u32 %s934_s30, 4  ;;  %s198_s7 = int_to_ptr.vmem [resolvable:$true] %s197_s7 }
  0x10   : > { %s935_s9 = smov [#allocation7]   ;;  %s795_s11 = scalar_lea.vmem %s198_s7, 2048 }
  0x11   : > { %s1195_s29 = scalar_select %p1019_p8, 1, 0 }
  0x12   : > { %p719_p9 = pneg %p1019_p8  ;;  %s213_s10 = sshll.u32 %s935_s9, 4  ;;  %s214_s10 = int_to_ptr.vmem [resolvable:$true] %s213_s10 }
  0x13   : > { %p796_p13 = scmp.ne.s32.totalorder %s198_s7, %s795_s11  ;;  %p803_p5 = scmp.lt.s32.totalorder %s198_s7, %s198_s7 }
  0x14   : > { %p1028_p11 = pnand %p719_p9, %p1188_p1  ;;  %p804_p7 = scmp.lt.s32.totalorder %s795_s11, %s795_s11 }
  0x16   : > { %p786_p12 = pneg %p1028_p11  ;;  %p805_p10 = por %p804_p7, %p803_p5 }
  0x18   : > { %p798_p0 = pnand %p796_p13, %p786_p12 }
  0x1a   : > { %p799_p3 = pneg %p798_p0 }
  0x1c   : > { %p806_p9 = pnand %p805_p10, %p799_p3 }
  0x1e   : > { %809 = shalt.err (!%p806_p9)
}
  0x1f   : > { %s936_s12 = smov 128   ;;  %s937_s13 = smov 8  }
  0x20   : > { %s1197_s1 = sld [smem:[#allocation12_spill]]  ;;  %s821_s16 = scalar_lea.vmem %s214_s10, 4096 }
  0x21   : > { %p822_p1 = scmp.ne.s32.totalorder %s214_s10, %s821_s16  ;;  %p829_p2 = scmp.lt.s32.totalorder %s214_s10, %s214_s10 }
  0x22   : > { %p830_p6 = scmp.lt.s32.totalorder %s821_s16, %s821_s16 }
  0x23   : > { %p824_p13 = pnand %p822_p1, %p786_p12 }
  0x24   : > { %p831_p5 = por %p830_p6, %p829_p2 }
  0x25   : > { %p825_p0 = pneg %p824_p13 }
  0x26   : > { %722 = dma.hbm_to_vmem [thread:$0]  (!%p1028_p11), %s1197_s1, 2048, %s198_s7, [#allocation6], %s936_s12, %s936_s12, %s937_s13  }
  0x27   : > { %p832_p10 = pnand %p831_p5, %p825_p0 }
  0x29   : > { %835 = shalt.err (!%p832_p10)
}
  0x2a   : > { %s938_s17 = smov 256   ;;  %s939_s18 = smov 16  }
  0x2b   : > { %725 = dma.hbm_to_vmem [thread:$0]  (!%p1028_p11), %s1184_s3, 4096, %s214_s10, [#allocation6], %s938_s17, %s938_s17, %s939_s18  }
  0x2c   : > { %s1051_s26 = sadd.s32 1, %s932_s24   ;;  %s30_s7 = sadd.s32 1, %s928_s23 }
  0x2d   : > { %s27_s30 = ssub.s32 %s932_s24, %s1051_s26  ;;  %p37_p2 = scmp.ne.s32.totalorder %s928_s23, %s924_s22 }
  0x2e   : > { %p28_p1 = scmp.eq.s32.totalorder %s27_s30, 0  ;;  %p38_p6 = scmp.eq.s32.totalorder %s932_s24, 0 }
  0x2f   : > { %p1198_p3 = scmp.eq.s32.totalorder %s1000_s25, 1  ;;  %p736_p9 = scmp.lt.s32.totalorder %s932_s24, 2 }
  0x30   : > { %s1060_s9 = scalar_select %p28_p1, %s928_s23, %s30_s7  }
  0x31   : > { %p39_p12 = por %p38_p6, %p37_p2  ;;  %p1064_p7 = por %p1198_p3, %p37_p2 }
  0x32   : > { %s233_s8 = sand.u32 1, %s928_s23   ;;  %s642_s10 = sshll.u32 %s932_s24, 7 }
  0x33   : > { %s1199_s11 = scalar_select %p1064_p7, 1, 0 }
  0x34   : > { %s641_s12 = sshll.u32 %s233_s8, 3  ;;  %s1074_s15 = scalar_lea.hbm %s1181_s0, %s642_s10 }
  0x35   : > { %s237_s16 = scalar_lea.vmem [#allocation2], %s641_s12  ;;  %p1076_p11 = pnand %p736_p9, %p39_p12 }
  0x36   : > { %s244_s17 = sshll.u32 %s237_s16, 4  ;;  %s234_s19 = scalar_lea.sflag [#allocation3], %s233_s8  ;;  %s245_s17 = int_to_ptr.vmem [resolvable:$true] %s244_s17 }
  0x37   : > { %s836_s20 = scalar_lea.hbm %s1074_s15, 128  ;;  %p838_p0 = pneg %p1076_p11 }
  0x38   : > { %p837_p13 = scmp.ne.s32.totalorder %s1074_s15, %s836_s20  ;;  %s841_s10 = scalar_lea.hbm %s1181_s0, 256 }
  0x39   : > { %p842_p1 = scmp.lt.s32.totalorder %s1074_s15, %s1181_s0  ;;  %p843_p2 = scmp.lt.s32.totalorder %s841_s10, %s836_s20 }
  0x3a   : > { %p839_p5 = pnand %p838_p0, %p837_p13 }
  0x3b   : > { %p844_p6 = por %p843_p2, %p842_p1 }
  0x3c   : > { %p840_p10 = pneg %p839_p5 }
  0x3e   : > { %p845_p12 = pnand %p844_p6, %p840_p10 }
  0x40   : > { %848 = shalt.err (!%p845_p12)
}
  0x41   : > { %s849_s14 = scalar_lea.vmem %s245_s17, 128  ;;  %s940_s8 = smov [#allocation2]  }
  0x42   : > { %p850_p3 = scmp.ne.s32.totalorder %s245_s17, %s849_s14  ;;  %s854_s16 = sshll.u32 %s940_s8, 4  ;;  %s855_s16 = int_to_ptr.vmem [resolvable:$false] %s854_s16 }
  0x43   : > { %s856_s1 = scalar_lea.vmem %s855_s16, 256  ;;  %p857_p13 = scmp.lt.s32.totalorder %s245_s17, %s855_s16 }
  0x44   : > { %p852_p9 = pnand %p850_p3, %p838_p0  ;;  %p858_p5 = scmp.lt.s32.totalorder %s856_s1, %s849_s14 }
  0x46   : > { %p853_p7 = pneg %p852_p9  ;;  %p859_p4 = por %p858_p5, %p857_p13 }
  0x48   : > { %p860_p8 = pnand %p859_p4, %p853_p7 }
  0x4a   : > { %863 = shalt.err (!%p860_p8)
}
  0x4b   : > { %729 = dma.hbm_to_vmem [thread:$0]  (!%p1076_p11), %s1074_s15, 128, %s245_s17, %s234_s19  }
  0x4c   : > { %p1201_p10 = scmp.ne.s32.totalorder %s1195_s29, 0 }
  0x4d   : > { %s1097_s20 = sand.u32 (!%p1201_p10), 1, %s924_s22   ;;  %p1202_p0 = scmp.ne.s32.totalorder (!%p1201_p10), %s1193_s27, 0 }
  0x4e   : > { %253 = sbr.rel (%p1201_p10) target bundleno = 703 (0x2bf), region = 44  ;;  %s644_s30 = sshll.u32 (!%p1201_p10), %s1097_s20, 3 }
  0x4f   : > { %s256_s7 = scalar_lea.sflag (!%p1201_p10), [#allocation3], %s1097_s20  ;;  %s1101_s10 = scalar_lea.vmem (!%p1201_p10), [#allocation2], %s644_s30 }
  0x53   : > { %907 = dma.done.wait (%p1202_p0), %s256_s7, 128  }
  0x54   : > { %909 = vsyncadd (%p1202_p0), %s256_s7, 4294967168  ;;  %p1203_p4 = scmp.eq.s32.totalorder %s1000_s25, 0 }
  0x56   : > { %911 = dma.done.wait (%p1203_p4), [#allocation6], 6144   ;;  %p1204_p8 = pmov %p1203_p4 }
  0x57   : > { %v941_v0 = vmov 0.0   ;;  %vm942_vm0 = vmmov 0   ;;  %v312_v1 = vld [vmem:[#allocation5 + $0x78] sm:$0xff]  ;;  %v311_v2 = vld [vmem:[#allocation5 + $0x70] sm:$0xff]  ;;  %v310_v3 = vld [vmem:[#allocation5 + $0x68] sm:$0xff]  ;;  %v425_v55 = vlaneseq  ;;  %s647_s17 = sshll.u32 %s1097_s20, 4 }
  0x58   : > { %913 = vsyncadd (%p1204_p8), [#allocation6], 4294961152  ;;  %672 = vmatprep.subr.mxu0 %v941_v0  ;;  %704 = vmatprep.mubr.msk.f32.mxu0 %vm942_vm0, %v941_v0  ;;  %v309_v4 = vld [vmem:[#allocation5 + $0x60] sm:$0xff]  ;;  %v308_v5 = vld [vmem:[#allocation5 + $0x58] sm:$0xff]  ;;  %s654_s13 = sshll.u32 %s1000_s25, 8  ;;  %s295_s12 = scalar_lea.vmem [#allocation8], %s647_s17 }
  0x59   : > { %499 = vmatprep.mubr.f32.mxu1 %v941_v0  ;;  %673 = vmatpush3.msra.mxu0 %v312_v1  ;;  %v422_v6 = vld [vmem:[#allocation7 + $0xf8] sm:$0xff]  ;;  %v421_v7 = vld [vmem:[#allocation7 + $0xf0] sm:$0xff]  ;;  %v420_v8 = vld [vmem:[#allocation7 + $0xe8] sm:$0xff]  ;;  %v426_v56 = vshrl.u32 %v425_v55, 7  ;;  %s547_s14 = sshll.u32 %s295_s12, 4  ;;  %s1144_s30 = scalar_lea.hbm %s1187_s6, %s654_s13  ;;  %s548_s14 = int_to_ptr.vmem [resolvable:$true] %s547_s14 }
  0x5a   : > { %674 = vmatprep.subr.mxu0 %v941_v0  ;;  %435 = vmatprep.subr.mxu1 %v422_v6  ;;  %v419_v9 = vld [vmem:[#allocation7 + $0xe0] sm:$0xff]  ;;  %v418_v10 = vld [vmem:[#allocation7 + $0xd8] sm:$0xff]  ;;  %v307_v11 = vld [vmem:[#allocation5 + $0x50] sm:$0xff]  ;;  %s533_s7 = scalar_lea.sflag [#allocation4], %s1097_s20  ;;  %p1205_p11 = scmp.ne.s32.totalorder %s1199_s11, 0 }
  0x5b   : > { %675 = vmatpush3.msra.mxu0 %v311_v2  ;;  %436 = vmatpush1.msra.mxu1 %v421_v7  ;;  %v417_v12 = vld [vmem:[#allocation7 + $0xd0] sm:$0xff]  ;;  %v416_v13 = vld [vmem:[#allocation7 + $0xc8] sm:$0xff]  ;;  %v415_v15 = vld [vmem:[#allocation7 + $0xc0] sm:$0xff]  ;;  %v427_v57 = vsub.s32 0, %v426_v56  ;;  %v431_v59 = vsub.s32 1, %v426_v56  ;;  %s943_s25 = smov [#allocation8]  }
  0x5c   : > { %676 = vmatprep.subr.mxu0 %v941_v0  ;;  %437 = vmatprep.subr.mxu1 %v420_v8  ;;  %v306_v14 = vld [vmem:[#allocation5 + $0x48] sm:$0xff]  ;;  %v414_v16 = vld [vmem:[#allocation7 + $0xb8] sm:$0xff]  ;;  %v305_v17 = vld [vmem:[#allocation5 + $0x40] sm:$0xff]  ;;  %s868_s1 = sshll.u32 %s943_s25, 4  ;;  %s869_s1 = int_to_ptr.vmem [resolvable:$false] %s868_s1 }
  0x5d   : > { %677 = vmatpush3.msra.mxu0 %v310_v3  ;;  %438 = vmatpush1.msra.mxu1 %v419_v9  ;;  %v413_v18 = vld [vmem:[#allocation7 + $0xb0] sm:$0xff]  ;;  %v412_v19 = vld [vmem:[#allocation7 + $0xa8] sm:$0xff]  ;;  %v304_v20 = vld [vmem:[#allocation5 + $0x38] sm:$0xff]  ;;  %s870_s27 = scalar_lea.vmem %s869_s1, 512  ;;  %p871_p6 = scmp.lt.s32.totalorder %s548_s14, %s869_s1 }
  0x5e   : > { %678 = vmatprep.subr.mxu0 %v941_v0  ;;  %439 = vmatprep.subr.mxu1 %v418_v10  ;;  %v411_v21 = vld [vmem:[#allocation7 + $0xa0] sm:$0xff]  ;;  %v410_v22 = vld [vmem:[#allocation7 + $0x98] sm:$0xff]  ;;  %v303_v23 = vld [vmem:[#allocation5 + $0x30] sm:$0xff] }
  0x5f   : > { %679 = vmatpush3.msra.mxu0 %v309_v4  ;;  %440 = vmatpush1.msra.mxu1 %v417_v12  ;;  %v409_v24 = vld [vmem:[#allocation7 + $0x90] sm:$0xff]  ;;  %v408_v25 = vld [vmem:[#allocation7 + $0x88] sm:$0xff]  ;;  %v301_v27 = vld [vmem:[#allocation5 + $0x20] sm:$0xff] }
  0x60   : > { %680 = vmatprep.subr.mxu0 %v941_v0  ;;  %441 = vmatprep.subr.mxu1 %v416_v13  ;;  %v302_v26 = vld [vmem:[#allocation5 + $0x28] sm:$0xff]  ;;  %v300_v28 = vld [vmem:[#allocation5 + $0x18] sm:$0xff]  ;;  %v299_v29 = vld [vmem:[#allocation5 + $0x10] sm:$0xff] }
  0x61   : > { %681 = vmatpush3.msra.mxu0 %v308_v5  ;;  %442 = vmatpush1.msra.mxu1 %v415_v15  ;;  %v298_v30 = vld [vmem:[#allocation5 + $0x8] sm:$0xff]  ;;  %v297_v31 = vld [vmem:[#allocation5] sm:$0xff]  ;;  %v296_v32 = vld [vmem:[%s1101_s10] sm:$0xff]  ;;  %s864_s10 = scalar_lea.vmem %s548_s14, 256 }
  0x62   : > { %682 = vmatprep.subr.mxu0 %v941_v0  ;;  %443 = vmatprep.subr.mxu1 %v414_v16  ;;  %v407_v33 = vld [vmem:[#allocation7 + $0x80] sm:$0xff]  ;;  %v406_v34 = vld [vmem:[#allocation7 + $0x78] sm:$0xff]  ;;  %v405_v35 = vld [vmem:[#allocation7 + $0x70] sm:$0xff]  ;;  %p865_p7 = scmp.ne.s32.totalorder %s548_s14, %s864_s10  ;;  %p872_p12 = scmp.lt.s32.totalorder %s870_s27, %s864_s10 }
  0x63   : > { %683 = vmatpush3.msra.mxu0 %v307_v11  ;;  %444 = vmatpush1.msra.mxu1 %v413_v18  ;;  %v404_v36 = vld [vmem:[#allocation7 + $0x68] sm:$0xff]  ;;  %v403_v37 = vld [vmem:[#allocation7 + $0x60] sm:$0xff]  ;;  %v402_v38 = vld [vmem:[#allocation7 + $0x58] sm:$0xff] }
  0x64   : > { %684 = vmatprep.subr.mxu0 %v941_v0  ;;  %445 = vmatprep.subr.mxu1 %v412_v19  ;;  %v401_v39 = vld [vmem:[#allocation7 + $0x50] sm:$0xff]  ;;  %v400_v40 = vld [vmem:[#allocation7 + $0x48] sm:$0xff]  ;;  %v399_v41 = vld [vmem:[#allocation7 + $0x40] sm:$0xff]  ;;  %p866_p1 = pnand %p865_p7, %p1205_p11  ;;  %p873_p3 = por %p872_p12, %p871_p6 }
  0x65   : > { %685 = vmatpush3.msra.mxu0 %v306_v14  ;;  %446 = vmatpush1.msra.mxu1 %v411_v21  ;;  %v398_v42 = vld [vmem:[#allocation7 + $0x38] sm:$0xff]  ;;  %v397_v43 = vld [vmem:[#allocation7 + $0x30] sm:$0xff]  ;;  %v396_v44 = vld [vmem:[#allocation7 + $0x28] sm:$0xff] }
  0x66   : > { %686 = vmatprep.subr.mxu0 %v941_v0  ;;  %447 = vmatprep.subr.mxu1 %v410_v22  ;;  %v395_v45 = vld [vmem:[#allocation7 + $0x20] sm:$0xff]  ;;  %v394_v46 = vld [vmem:[#allocation7 + $0x18] sm:$0xff]  ;;  %v393_v47 = vld [vmem:[#allocation7 + $0x10] sm:$0xff]  ;;  %p867_p2 = pneg %p866_p1 }
  0x67   : > { %687 = vmatpush3.msra.mxu0 %v305_v17  ;;  %448 = vmatpush1.msra.mxu1 %v409_v24  ;;  %v392_v48 = vld [vmem:[#allocation7 + $0x8] sm:$0xff]  ;;  %v391_v49 = vld [vmem:[#allocation7] sm:$0xff]  ;;  %v648_v50 = vld [vmem:[%s1183_s2] ss:$0 sm:$0xff] }
  0x68   : > { %688 = vmatprep.subr.mxu0 %v941_v0  ;;  %449 = vmatprep.subr.mxu1 %v408_v25  ;;  %v423_v58 = vld [vmem:[%s1185_s4] sm:$0x3]  ;;  %p874_p9 = pnand %p873_p3, %p867_p2 }
  0x69   : > { %689 = vmatpush3.msra.mxu0 %v304_v20  ;;  %450 = vmatpush1.msra.mxu1 %v407_v33  ;;  %v428_v60 = vrot.slane %v423_v58, %v427_v57  ;;  %v432_v61 = vrot.slane %v423_v58, %v431_v59  ;;  %v516_v8 = vld [vmem:[%s1186_s5] sm:$0x3] }
  0x6a   : > { %690 = vmatprep.subr.mxu0 %v941_v0  ;;  %451 = vmatprep.subr.mxu1 %v406_v34  ;;  %v521_v9 = vrot.slane %v516_v8, %v427_v57  ;;  %v525_v10 = vrot.slane %v516_v8, %v431_v59 }
  0x6b   : > { %691 = vmatpush3.msra.mxu0 %v303_v23  ;;  %452 = vmatpush1.msra.mxu1 %v405_v35 }
  0x6c   : > { %692 = vmatprep.subr.mxu0 %v941_v0  ;;  %453 = vmatprep.subr.mxu1 %v404_v36 }
  0x6d   : > { %693 = vmatpush3.msra.mxu0 %v302_v26  ;;  %454 = vmatpush1.msra.mxu1 %v403_v37 }
  0x6e   : > { %694 = vmatprep.subr.mxu0 %v941_v0  ;;  %455 = vmatprep.subr.mxu1 %v402_v38 }
  0x6f   : > { %695 = vmatpush3.msra.mxu0 %v301_v27  ;;  %456 = vmatpush1.msra.mxu1 %v401_v39 }
  0x70   : > { %696 = vmatprep.subr.mxu0 %v941_v0  ;;  %457 = vmatprep.subr.mxu1 %v400_v40 }
  0x71   : > { %697 = vmatpush3.msra.mxu0 %v300_v28  ;;  %458 = vmatpush1.msra.mxu1 %v399_v41 }
  0x72   : > { %698 = vmatprep.subr.mxu0 %v941_v0  ;;  %459 = vmatprep.subr.mxu1 %v398_v42 }
  0x73   : > { %699 = vmatpush3.msra.mxu0 %v299_v29  ;;  %460 = vmatpush1.msra.mxu1 %v397_v43 }
  0x74   : > { %700 = vmatprep.subr.mxu0 %v941_v0  ;;  %461 = vmatprep.subr.mxu1 %v396_v44 }
  0x75   : > { %701 = vmatpush3.msra.mxu0 %v298_v30  ;;  %462 = vmatpush1.msra.mxu1 %v395_v45 }
  0x76   : > { %702 = vmatprep.subr.mxu0 %v941_v0  ;;  %463 = vmatprep.subr.mxu1 %v394_v46 }
  0x77   : > { %703 = vmatpush3.msra.mxu0 %v297_v31  ;;  %464 = vmatpush1.msra.mxu1 %v393_v47 }
  0x78   : > { %705 = vmatmul.mubr.f32.vlgmr.msra.gmra.mxu0 %v296_v32  ;;  %465 = vmatprep.subr.mxu1 %v392_v48 }
  0x79   : > { %466 = vmatpush1.msra.mxu1 %v391_v49 }
 0x138   : > { %v386_v51 = vpop.f32.mrf.mxu0 }
 0x139   : > { %v387_v52 = vadd.f32 %v648_v50, %v386_v51 }
 0x13a   : > { %v706_v53 = vpop.f32.mrf.mxu0 }
 0x13b   : > { %780 = vtanh.f32 %v387_v52 }
 0x148   : > { %v781_v54 = vpop.eup %780 }
 0x149   : > { %500 = vmatmul.mubr.f32.vlgmr.msra.gmra.mxu1 %v781_v54 }
 0x209   : > { %v501_v62 = vpop.f32.mrf.mxu1 }
 0x20a   : > { %v502_v63 = vadd.f32 %v501_v62, %v428_v60 }
 0x20b   : > { %v503_v0 = vpop.f32.mrf.mxu1 }
 0x20c   : > { %v504_v1 = vadd.f32 %v503_v0, %v432_v61  ;;  %v506_v2 = vmul.f32 %v502_v63, %v502_v63 }
 0x20e   : > { %v507_v3 = vmul.f32 %v504_v1, %v504_v1 }
 0x210   : > { %v508_v4 = vadd.f32 %v507_v3, %v506_v2 }
 0x212   : > { %509 = vadd.xlane.f32.xlu0 %v508_v4 }
 0x29b   : > { %v510_v5 = vpop.xlane.xlu0 %509 }
 0x29c   : > { %v511_v6 = vmul.f32 0.00390625, %v510_v5 }
 0x29e   : > { %v512_v7 = vadd.f32 1e-06, %v511_v6 }
 0x2a0   : > { %782 = vrsqrt.f32 %v512_v7 }
 0x2ad   : > { %v783_v11 = vpop.eup %782 }
 0x2ae   : > { %v514_v12 = vmul.f32 %v783_v11, %v502_v63  ;;  %v515_v13 = vmul.f32 %v783_v11, %v504_v1 }
 0x2b0   : > { %v528_v14 = vmul.f32 %v521_v9, %v514_v12  ;;  %v529_v15 = vmul.f32 %v525_v10, %v515_v13 }
 0x2b2   : > { %530 = vst [vmem:[%s295_s12] sm:$0xff] %v528_v14  ;;  %531 = vst [vmem:[%s295_s12 + $0x8] sm:$0xff] %v529_v15 }
 0x2b3   : > { %877 = shalt.err (!%p874_p9)
}
 0x2b4   : > { %s878_s29 = scalar_lea.hbm %s1144_s30, 256  ;;  %s882_s17 = scalar_lea.hbm %s1187_s6, 512 }
 0x2b5   : > { %p879_p13 = scmp.ne.s32.totalorder %s1144_s30, %s878_s29  ;;  %p883_p0 = scmp.lt.s32.totalorder %s1144_s30, %s1187_s6 }
 0x2b6   : > { %p884_p4 = scmp.lt.s32.totalorder %s882_s17, %s878_s29 }
 0x2b7   : > { %p880_p5 = pnand %p879_p13, %p1205_p11 }
 0x2b8   : > { %p885_p8 = por %p884_p4, %p883_p0 }
 0x2b9   : > { %p881_p10 = pneg %p880_p5 }
 0x2bb   : > { %p886_p7 = pnand %p885_p8, %p881_p10 }
 0x2bd   : > { %889 = shalt.err (!%p886_p7)
}
 0x2be   : > { %717 = dma.vmem_to_hbm [thread:$0]  (%p1205_p11), %s548_s14, 256, %s1144_s30, %s533_s7  }
 0x2bf PF: > { %s559_s13 = sand.u32 1, %s920_s21   ;;  %p1206_p1 = scmp.ne.s32.totalorder %s1194_s28, 0 }
 0x2c0   : > { %p1207_p2 = scmp.ge.s32.totalorder %s932_s24, 2  ;;  %s560_s12 = scalar_lea.sflag [#allocation4], %s559_s13 }
 0x2c2   : > { %p731_p6 = pnand %p1207_p2, %p1206_p1 }
 0x2c4   : > { %p732_p12 = pneg %p731_p6 }
 0x2c6   : > { %915 = dma.done.wait (%p732_p12), %s560_s12, 256  }
 0x2c7   : > { %917 = vsyncadd (%p732_p12), %s560_s12, 4294967040  ;;  %p20_p3 = scmp.ge.s32.totalorder %s1051_s26, 4   ;;  %s1208_s21 = smov %s924_s22 }
 0x2c8   : > { %s1209_s22 = smov %s928_s23  ;;  %s1210_s23 = smov %s1060_s9 }
 0x2c9   : > { %s1211_s24 = smov %s1051_s26  ;;  %22 = sbr.rel (!%p20_p3) target bundleno = 8 (0x8), region = 97 }
 0x2ce   :  { %565 = vsyncpa [#allocation3], 1 }
 0x2cf   :  { %567 = vsyncpa [#allocation3 + $0x1], 1 }
 0x2d0   :  { %568 = vsyncpa [#allocation6], 1 }
 0x2d1   :  { %569 = vsyncpa [#allocation4], 1 }
 0x2d2   :  { %571 = vsyncpa [#allocation4 + $0x1], 1 }

</bundles_post_ra>
